<compile_context>
chip_gen: v6e
topology: v6e:2x2x1
jax: 0.10.0
libtpu: 0.0.40
codegen_flags: <defaults>
</compile_context>

<pallas_src>
import jax
import jax.numpy as jnp
from jax.experimental import pallas as pl
from jax.experimental.pallas import tpu as pltpu


def attn_kernel(q_ref, kT_ref, v_ref, o_ref):
    # q_ref : (tm, query_dim)      collapsed (batch*head) rows for this M tile
    # kT_ref: (key_dim, n_head)    key parameter, stored pre-transposed
    # v_ref : (seq_len, v_dim)     value (seq_len == n_head)
    q = q_ref[...]
    kT = kT_ref[...]
    v = v_ref[...]

    scale = 1.0 / (q.shape[-1] ** 0.5)

    # (tm, n_head) scores on the MXU, f32 accumulation
    qk = jnp.dot(q, kT, preferred_element_type=jnp.float32) * scale

    # numerically stable row softmax; EUP approx reciprocal + one Newton step (keeps ~f32 precision)
    m = jnp.max(qk, axis=-1, keepdims=True)
    e = jnp.exp(qk - m)
    s = jnp.sum(e, axis=-1, keepdims=True)
    inv = pl.reciprocal(s, approx=True)
    inv = inv * (2.0 - s * inv)  # Newton refinement: restores 1e-5 tolerance, no VALU divide chain
    p = e * inv

    # TODO(synk): dropout is identity here (eval-mode semantics); training parity would need
    # an in-kernel pltpu.prng_seed/prng_random_bits mask.

    # (tm, v_dim) output on the MXU (p cast to value dtype so the bf16 path feeds the MXU natively)
    o_ref[...] = jnp.dot(p.astype(v.dtype), v, preferred_element_type=jnp.float32).astype(o_ref.dtype)


def model_forward(query, kT_param, value, *, use_bf16=False):
    """query: (B, n_head, query_dim); kT_param: (key_dim, n_head) pre-transposed key; value: (seq_len, v_dim)."""
    B, n_head, query_dim = query.shape
    key_dim, kh = kT_param.shape
    seq_len, v_dim = value.shape
    assert kh == seq_len, "torch matmul broadcasting requires seq_len == n_head(key rows)"
    assert query_dim == key_dim, "query @ key.T requires query_dim == key_dim"

    # Collapse batch*head into the matmul M dimension (wrapper-side layout plumbing).
    M = B * n_head
    q2d = query.reshape(M, query_dim)

    if use_bf16:
        # Large-M serving path for v6e/v7x: halves HBM bytes on the dominant q stream,
        # MXU runs at native bf16 rate; softmax math stays f32 inside the kernel.
        q2d = q2d.astype(jnp.bfloat16)
        kT_param = kT_param.astype(jnp.bfloat16)
        value = value.astype(jnp.bfloat16)

    # Bounded M tile: single step at small M, 512-row tiles (mult. of 8 sublanes) at large M.
    # cdiv grid handles ragged M; rows are independent so padded tail rows are harmless.
    tm = min(512, -(-M // 8) * 8)
    grid = (pl.cdiv(M, tm),)

    out2d = pl.pallas_call(
        attn_kernel,
        out_shape=jax.ShapeDtypeStruct((M, v_dim), jnp.float32),
        grid=grid,
        in_specs=[
            pl.BlockSpec((tm, query_dim), lambda i: (i, 0)),
            pl.BlockSpec((key_dim, kh), lambda i: (0, 0)),   # resident across M tiles
            pl.BlockSpec((seq_len, v_dim), lambda i: (0, 0)),  # resident across M tiles
        ],
        out_specs=pl.BlockSpec((tm, v_dim), lambda i: (i, 0)),
        compiler_params=pltpu.CompilerParams(
            dimension_semantics=("parallel",),
        ),
    )(q2d, kT_param, value)

    return out2d.reshape(B, n_head, v_dim)


if __name__ == "__main__":
    key_dim = 32
    n_head = 16
    query_dim = 32
    batch_size = 2
    seq_len = 16  # must equal n_head for the reference torch matmul to be valid

    rng = jax.random.PRNGKey(0)
    k_q, k_key, k_val, k_p = jax.random.split(rng, 4)

    # inputs (torch.randn analogue)
    query = jax.random.normal(k_q, (batch_size, n_head, query_dim), dtype=jnp.float32)
    value = jax.random.normal(k_val, (seq_len, query_dim), dtype=jnp.float32)

    # parameters (torch.rand analogue -> uniform [0,1)); self.query is unused in forward
    key_param = jax.random.uniform(k_key, (n_head, key_dim), dtype=jnp.float32)
    _query_param_unused = jax.random.uniform(k_p, (n_head, query_dim), dtype=jnp.float32)

    # Store the key parameter pre-transposed ONCE at init time (not per forward call).
    kT_param = key_param.T  # (key_dim, n_head)

    out = model_forward(query, kT_param, value)
    out = jax.block_until_ready(out)

    # reference check in plain JAX
    scale = 1.0 / (query.shape[-1] ** 0.5)
    qk = jnp.einsum("bhd,kd->bhk", query, key_param) * scale
    ref = jnp.einsum("bhk,kd->bhd", jax.nn.softmax(qk, axis=-1), value)
    assert out.shape == (batch_size, n_head, query_dim)
    assert jnp.allclose(out, ref, atol=1e-5, rtol=1e-5)

    print("KERNEL_OK")
</pallas_src>

<mosaic_0001>
module attributes {stable_mosaic.version = 11 : i64} {
  func.func @attn_kernel(%arg0: i32, %arg1: memref<32x32xf32, #tpu.memory_space<vmem>>, %arg2: memref<32x16xf32, #tpu.memory_space<vmem>>, %arg3: memref<16x32xf32, #tpu.memory_space<vmem>>, %arg4: memref<32x32xf32, #tpu.memory_space<vmem>>) attributes {dimension_semantics = [#tpu.dimension_semantics<parallel>], iteration_bounds = array<i64: 1>, scalar_prefetch = 0 : i64, scratch_operands = 0 : i64, tpu.core_type = #tpu.core_type<tc>, window_params = [{transform_indices = @transform_0, window_bounds = array<i64: 32, 32>}, {pipeline_mode = #tpu.pipeline_mode<synchronous>, transform_indices = @transform_1, window_bounds = array<i64: 32, 16>}, {pipeline_mode = #tpu.pipeline_mode<synchronous>, transform_indices = @transform_2, window_bounds = array<i64: 16, 32>}, {transform_indices = @transform_3, window_bounds = array<i64: 32, 32>}]} {
    %c0 = arith.constant 0 : index
    %c0_0 = arith.constant 0 : index
    %0 = vector.load %arg1[%c0, %c0_0] : memref<32x32xf32, #tpu.memory_space<vmem>>, vector<32x32xf32>
    %c0_1 = arith.constant 0 : index
    %c0_2 = arith.constant 0 : index
    %1 = vector.load %arg2[%c0_1, %c0_2] : memref<32x16xf32, #tpu.memory_space<vmem>>, vector<32x16xf32>
    %c0_3 = arith.constant 0 : index
    %c0_4 = arith.constant 0 : index
    %2 = vector.load %arg3[%c0_3, %c0_4] : memref<16x32xf32, #tpu.memory_space<vmem>>, vector<16x32xf32>
    %cst = arith.constant dense<0.000000e+00> : vector<32x16xf32>
    %3 = tpu.matmul %0, %1, %cst {dimension_numbers = #tpu.dot_dimension_numbers<[1], [0], [0], [1], [0, 0, 1, 1], [], []>} : vector<32x32xf32>, vector<32x16xf32>, vector<32x16xf32> -> vector<32x16xf32>
    %cst_5 = arith.constant 0.176776692 : f32
    %4 = vector.broadcast %cst_5 : f32 to vector<32x16xf32>
    %5 = arith.mulf %3, %4 : vector<32x16xf32>
    %cst_6 = arith.constant dense<0xFF800000> : vector<32xf32>
    %6 = vector.multi_reduction <maximumf>, %5, %cst_6 [1] : vector<32x16xf32> to vector<32xf32>
    %7 = vector.shape_cast %6 : vector<32xf32> to vector<32x1xf32>
    %8 = vector.broadcast %7 : vector<32x1xf32> to vector<32x16xf32>
    %9 = arith.subf %5, %8 : vector<32x16xf32>
    %10 = math.exp %9 : vector<32x16xf32>
    %cst_7 = arith.constant dense<0.000000e+00> : vector<32xf32>
    %11 = vector.multi_reduction <add>, %10, %cst_7 [1] : vector<32x16xf32> to vector<32xf32>
    %12 = vector.shape_cast %11 : vector<32xf32> to vector<32x1xf32>
    %13 = tpu.reciprocal %12 {approx = true} : vector<32x1xf32> -> vector<32x1xf32>
    %14 = arith.mulf %12, %13 : vector<32x1xf32>
    %cst_8 = arith.constant 2.000000e+00 : f32
    %15 = vector.broadcast %cst_8 : f32 to vector<32x1xf32>
    %16 = arith.subf %15, %14 : vector<32x1xf32>
    %17 = arith.mulf %13, %16 : vector<32x1xf32>
    %18 = vector.broadcast %17 : vector<32x1xf32> to vector<32x16xf32>
    %19 = arith.mulf %10, %18 : vector<32x16xf32>
    %cst_9 = arith.constant dense<0.000000e+00> : vector<32x32xf32>
    %20 = tpu.matmul %19, %2, %cst_9 {dimension_numbers = #tpu.dot_dimension_numbers<[1], [0], [0], [1], [0, 0, 1, 1], [], []>} : vector<32x16xf32>, vector<16x32xf32>, vector<32x32xf32> -> vector<32x32xf32>
    %c0_10 = arith.constant 0 : index
    %c0_11 = arith.constant 0 : index
    %21 = vector.load %arg4[%c0_10, %c0_11] : memref<32x32xf32, #tpu.memory_space<vmem>>, vector<32x32xf32>
    tpu.vector_store %arg4[%c0_10, %c0_11], %20 {strides = array<i32>} : memref<32x32xf32, #tpu.memory_space<vmem>>, vector<32x32xf32>,
    return
  }
  func.func @transform_0(%arg0: i32) -> (i32, i32) {
    %c0_i32 = arith.constant 0 : i32
    %c0_i32_0 = arith.constant 0 : i32
    return %arg0, %c0_i32 : i32, i32
  }
  func.func @transform_1(%arg0: i32) -> (i32, i32) {
    %c0_i32 = arith.constant 0 : i32
    %c0_i32_0 = arith.constant 0 : i32
    %c0_i32_1 = arith.constant 0 : i32
    return %c0_i32, %c0_i32_0 : i32, i32
  }
  func.func @transform_2(%arg0: i32) -> (i32, i32) {
    %c0_i32 = arith.constant 0 : i32
    %c0_i32_0 = arith.constant 0 : i32
    %c0_i32_1 = arith.constant 0 : i32
    return %c0_i32, %c0_i32_0 : i32, i32
  }
  func.func @transform_3(%arg0: i32) -> (i32, i32) {
    %c0_i32 = arith.constant 0 : i32
    %c0_i32_0 = arith.constant 0 : i32
    return %arg0, %c0_i32 : i32, i32
  }
}

</mosaic_0001>

<bundles_post_ra>
// kernel: tpu_custom_call.1
= control target key start
LH: loop header
LB: loop body
LE: loop exit
PB: predicated region body
PF: predicated region fallthrough
CT: control target
= control target key end

     0   :  { %vm25_vm0 = vcmask 261120   ;;  %s464_s0 = inlined_call_operand.vmem [shape: f32[32,32], index: 0, kind: input, shape index: {}]   ;;  %s465_s1 = inlined_call_operand.vmem [shape: f32[32,16], index: 1, kind: input, shape index: {}]   ;;  %s466_s2 = inlined_call_operand.vmem [shape: f32[16,32], index: 2, kind: input, shape index: {}]   ;;  %s467_s3 = inlined_call_operand.hbm [shape: f32[32,32], index: 3, kind: output, shape index: {}]  }
   0x1   :  { %v22_v0 = vld [vmem:[%s465_s1 + $0x18] sm:$0xff]  ;;  %v21_v1 = vld [vmem:[%s465_s1 + $0x10] sm:$0xff]  ;;  %v15_v2 = vld [vmem:[%s464_s0] sm:$0xff] }
   0x2   :  { %323 = vmatprep.subr.mxu0 %v22_v0  ;;  %v20_v3 = vld [vmem:[%s465_s1 + $0x8] sm:$0xff]  ;;  %331 = vmatprep.mubr.msk.f32.mxu0 %vm25_vm0, %v15_v2 }
   0x3   :  { %324 = vmatpush3.msra.mxu0 %v22_v0 }
   0x4   :  { %8 = vsyncpa [#allocation3], 0  ;;  %325 = vmatprep.subr.mxu0 %v21_v1  ;;  %v19_v4 = vld [vmem:[%s465_s1] sm:$0xff]  ;;  %v16_v5 = vld [vmem:[%s464_s0 + $0x8] sm:$0xff]  ;;  %vm127_vm1 = vcmask 130048  }
   0x5   :  { %326 = vmatpush3.msra.mxu0 %v21_v1  ;;  %v17_v6 = vld [vmem:[%s464_s0 + $0x10] sm:$0xff]  ;;  %v18_v7 = vld [vmem:[%s464_s0 + $0x18] sm:$0xff]  ;;  %v24_v40 = vld [vmem:[%s466_s2 + $0x8] sm:$0xff] }
   0x6   :  { %327 = vmatprep.subr.mxu0 %v20_v3  ;;  %337 = vmatprep.subr.mxu1 %v24_v40  ;;  %v23_v41 = vld [vmem:[%s466_s2] sm:$0xff]  ;;  %s388_s2 = smov [#allocation2]  }
   0x7   :  { %328 = vmatpush3.msra.mxu0 %v20_v3  ;;  %338 = vmatpush3.msra.mxu1 %v24_v40  ;;  %s290_s30 = sshll.u32 %s388_s2, 4  ;;  %s291_s30 = int_to_ptr.vmem [resolvable:$true] %s290_s30 }
   0x8   :  { %329 = vmatprep.subr.mxu0 %v19_v4  ;;  %339 = vmatprep.subr.mxu1 %v23_v41  ;;  %s366_s4 = scalar_lea.vmem %s291_s30, 512  ;;  %p371_p1 = scmp.lt.s32.totalorder %s291_s30, %s291_s30 }
   0x9   :  { %330 = vmatpush3.msra.mxu0 %v19_v4  ;;  %340 = vmatpush3.msra.mxu1 %v23_v41  ;;  %p367_p0 = scmp.ne.s32.totalorder %s291_s30, %s366_s4  ;;  %p372_p2 = scmp.lt.s32.totalorder %s366_s4, %s366_s4 }
   0xa   :  { %332 = vmatmul.mubr.msk.f32.vlgmr.msra.gmra.mxu0 %vm25_vm0, %v16_v5 }
   0xb   :  { %334 = vmatprep.mubr.msk.f32.mxu0 %vm25_vm0, %v17_v6  ;;  %p373_p3 = por %p372_p2, %p371_p1 }
   0xd   :  { %p374_p4 = pnand %p373_p3, %p367_p0 }
   0xe   :  { %335 = vmatmul.mubr.msk.f32.gmra.mxu0 %vm25_vm0, %v18_v7 }
  0xca   :  { %v333_v8 = vpop.f32.mrf.mxu0 }
  0xcb   :  { %v124_v12 = vmul.f32 0.17677669, %v333_v8 }
  0xcc   :  { %v104_v9 = vpop.f32.mrf.mxu0 }
  0xcd   :  { %v123_v10 = vmul.f32 0.17677669, %v104_v9  ;;  %v131_v17 = vsel %vm127_vm1, %v124_v12, -inf }
  0xce   :  { %v336_v11 = vpop.f32.mrf.mxu0 }
  0xcf   :  { %v128_v13 = vsel %vm127_vm1, %v123_v10, -inf  ;;  %v126_v16 = vmul.f32 0.17677669, %v336_v11 }
  0xd0   :  { %129 = vmax.xlane.f32.xlu0 %v128_v13  ;;  %v114_v14 = vpop.f32.mrf.mxu0 }
  0xd1   :  { %v125_v15 = vmul.f32 0.17677669, %v114_v14  ;;  %v137_v19 = vsel %vm127_vm1, %v126_v16, -inf }
  0xd3   :  { %v134_v18 = vsel %vm127_vm1, %v125_v15, -inf }
  0xd4   :  { %132 = vmax.xlane.f32.xlu0 %v131_v17  ;;  %135 = vmax.xlane.f32.xlu1 %v134_v18 }
  0xd8   :  { %138 = vmax.xlane.f32.xlu1 %v137_v19 }
 0x159   :  { %v130_v20 = vpop.xlane.xlu0 %129 }
 0x15a   :  { %v140_v21 = vsub.f32 %v123_v10, %v130_v20 }
 0x15c   :  { %v144_v22 = vmul.f32 1.442695, %v140_v21 }
 0x15d   :  { %v133_v23 = vpop.xlane.xlu0 %132  ;;  %v136_v24 = vpop.xlane.xlu1 %135 }
 0x15e   :  { %350 = vpow2.f32 %v144_v22  ;;  %v141_v25 = vsub.f32 %v124_v12, %v133_v23  ;;  %v142_v26 = vsub.f32 %v125_v15, %v136_v24 }
 0x160   :  { %v146_v27 = vmul.f32 1.442695, %v141_v25  ;;  %v148_v28 = vmul.f32 1.442695, %v142_v26 }
 0x161   :  { %v139_v29 = vpop.xlane.xlu1 %138 }
 0x162   :  { %352 = vpow2.f32 %v146_v27  ;;  %v143_v30 = vsub.f32 %v126_v16, %v139_v29 }
 0x163   :  { %354 = vpow2.f32 %v148_v28 }
 0x164   :  { %v150_v31 = vmul.f32 1.442695, %v143_v30 }
 0x166   :  { %356 = vpow2.f32 %v150_v31 }
 0x16b   :  { %v351_v32 = vpop.eup %350 }
 0x16c   :  { %v152_v33 = vsel %vm127_vm1, %v351_v32, 0.0 }
 0x16d   :  { %153 = vadd.xlane.f32.xlu0 %v152_v33 }
 0x16f   :  { %v353_v34 = vpop.eup %352 }
 0x170   :  { %v355_v35 = vpop.eup %354  ;;  %v155_v36 = vsel %vm127_vm1, %v353_v34, 0.0 }
 0x171   :  { %156 = vadd.xlane.f32.xlu1 %v155_v36  ;;  %v158_v37 = vsel %vm127_vm1, %v355_v35, 0.0 }
 0x172   :  { %159 = vadd.xlane.f32.xlu0 %v158_v37 }
 0x173   :  { %v357_v38 = vpop.eup %356 }
 0x174   :  { %v161_v39 = vsel %vm127_vm1, %v357_v38, 0.0 }
 0x175   :  { %162 = vadd.xlane.f32.xlu1 %v161_v39 }
 0x1f6   :  { %v154_v42 = vpop.xlane.xlu0 %153 }
 0x1f7   :  { %358 = vrcp.f32 %v154_v42 }
 0x1fa   :  { %v157_v43 = vpop.xlane.xlu1 %156 }
 0x1fb   :  { %v160_v44 = vpop.xlane.xlu0 %159  ;;  %360 = vrcp.f32 %v157_v43 }
 0x1fc   :  { %362 = vrcp.f32 %v160_v44 }
 0x1fe   :  { %v163_v45 = vpop.xlane.xlu1 %162 }
 0x1ff   :  { %364 = vrcp.f32 %v163_v45 }
 0x204   :  { %v359_v46 = vpop.eup %358 }
 0x205   :  { %v168_v47 = vmul.f32 %v359_v46, %v154_v42 }
 0x207   :  { %v172_v48 = vsub.f32 2.0, %v168_v47 }
 0x208   :  { %v361_v49 = vpop.eup %360 }
 0x209   :  { %v363_v50 = vpop.eup %362  ;;  %v169_v51 = vmul.f32 %v361_v49, %v157_v43  ;;  %v176_v52 = vmul.f32 %v359_v46, %v172_v48 }
 0x20a   :  { %v170_v53 = vmul.f32 %v363_v50, %v160_v44 }
 0x20b   :  { %v173_v54 = vsub.f32 2.0, %v169_v51  ;;  %v180_v55 = vmul.f32 %v351_v32, %v176_v52 }
 0x20c   :  { %v365_v56 = vpop.eup %364  ;;  %v174_v57 = vsub.f32 2.0, %v170_v53 }
 0x20d   :  { %v177_v58 = vmul.f32 %v361_v49, %v173_v54  ;;  %v171_v59 = vmul.f32 %v365_v56, %v163_v45  ;;  %341 = vmatprep.mubr.msk.f32.mxu1 %vm127_vm1, %v180_v55 }
 0x20e   :  { %v178_v60 = vmul.f32 %v363_v50, %v174_v57 }
 0x20f   :  { %v181_v61 = vmul.f32 %v353_v34, %v177_v58  ;;  %v175_v62 = vsub.f32 2.0, %v171_v59 }
 0x210   :  { %v182_v63 = vmul.f32 %v355_v35, %v178_v60 }
 0x211   :  { %v179_v0 = vmul.f32 %v365_v56, %v175_v62  ;;  %342 = vmatmul.mubr.msk.f32.vlgmr.msra.gmra.mxu1 %vm127_vm1, %v181_v61 }
 0x212   :  { %344 = vmatprep.mubr.msk.f32.mxu1 %vm127_vm1, %v182_v63 }
 0x213   :  { %v183_v1 = vmul.f32 %v357_v38, %v179_v0 }
 0x215   :  { %345 = vmatmul.mubr.msk.f32.gmra.mxu1 %vm127_vm1, %v183_v1 }
 0x2d1   :  { %v343_v2 = vpop.f32.mrf.mxu1 }
 0x2d2   :  { %282 = vst.msk [vmem:[#allocation2 + $0x8] sm:$0xff] %vm25_vm0, %v343_v2 }
 0x2d3   :  { %v262_v3 = vpop.f32.mrf.mxu1 }
 0x2d4   :  { %281 = vst.msk [vmem:[#allocation2] sm:$0xff] %vm25_vm0, %v262_v3 }
 0x2d5   :  { %v346_v4 = vpop.f32.mrf.mxu1 }
 0x2d6   :  { %284 = vst.msk [vmem:[#allocation2 + $0x18] sm:$0xff] %vm25_vm0, %v346_v4 }
 0x2d7   :  { %v272_v5 = vpop.f32.mrf.mxu1 }
 0x2d8   :  { %283 = vst.msk [vmem:[#allocation2 + $0x10] sm:$0xff] %vm25_vm0, %v272_v5 }
 0x2d9   :  { %377 = shalt.err (!%p374_p4)
}
 0x2da   :  { %s389_s5 = smov 128   ;;  %s390_s6 = smov 8  }
 0x2db   :  { %296 = dma.vmem_to_hbm [thread:$0]  %s291_s30, 512, %s467_s3, [#allocation3], %s389_s5, %s389_s5, %s390_s6  }
 0x2dc   :  { %386 = dma.done.wait [#allocation3], 512  }
 0x2dd   :  { %387 = vsyncadd [#allocation3], 4294966784 }
 0x2de   :  { %300 = vsyncpa [#allocation3], 1 }

</bundles_post_ra>
